<compile_context>
chip_gen: v7x
topology: tpu7x:2x2x1
jax: 0.10.0
libtpu: 0.0.40
codegen_flags: <defaults>
</compile_context>

<pallas_src>
import math

import jax
import jax.numpy as jnp
from jax.experimental import pallas as pl
from jax.experimental.pallas import tpu as pltpu

_LANE = 128
_OUT_NARROW = 8          # stored output lanes (2 real heads + 6 zero lanes)


def _round_up(x, m):
    return ((x + m - 1) // m) * m


def _make_fused_kernel(lr, le):
    """Fused obs assembly + 3-layer MLP + relu-value/trunc epilogue."""

    def kernel(*refs):
        if le > 0:
            (reg_ref, exp_ref, inv_ref,
             w1_ref, b1_ref, w2_ref, b2_ref, w3_ref, b3_ref, out_ref) = refs
        else:
            (reg_ref, inv_ref,
             w1_ref, b1_ref, w2_ref, b2_ref, w3_ref, b3_ref, out_ref) = refs

        # ---- fused observation assembly (concat of history tails) ----------
        hist_r = reg_ref.shape[1]
        reg = reg_ref[:, hist_r - lr:]                       # (TB, lr)
        if le > 0:
            hist_e = exp_ref.shape[1]
            exp = exp_ref[:, hist_e - le:]                   # (TB, le)
            obs = jnp.concatenate([reg, exp], axis=-1)       # (TB, lr+le)
        else:
            obs = reg

        # ---- layer 0: Linear(lr+le -> H1) + relu ----------------------------
        # inventory is added to obs column 0 (first regular-order column), so
        # it contributes inv * W1[row 0] — read that row in-kernel.
        h = jnp.dot(obs, w1_ref[...], preferred_element_type=jnp.float32)
        h = h + inv_ref[...] * w1_ref[0:1, :] + b1_ref[...]
        h = jnp.maximum(h, 0.0)

        # ---- layer 1: Linear(H1 -> H2) + relu --------------------------------
        h = jnp.dot(h, w2_ref[...], preferred_element_type=jnp.float32) + b2_ref[...]
        h = jnp.maximum(h, 0.0)

        # ---- output layer: Linear(H2 -> 2), computed 128-wide on the MXU ----
        h = jnp.dot(h, w3_ref[...], preferred_element_type=jnp.float32) + b3_ref[...]

        # Narrow before the epilogue; only the stored lanes need VPU work.
        hs = h[:, :out_ref.shape[1]]
        # "h = h - h.detach() * (h <= 0)"  -> forward value is h * (h > 0)
        hs = jnp.where(hs <= 0.0, 0.0, hs)
        # "h = h - frac(h).detach()"       -> trunc(h); floor == trunc (h >= 0)
        out_ref[...] = jnp.floor(hs)

    return kernel


def mlp_forward_pallas(reg, exp, inv, lr, le,
                       w1, b1, w2, b2, w3, b3,
                       out_n=_OUT_NARROW, max_batch_tile=1024):
    B = reg.shape[0]

    # Pad batch to a sublane multiple; aim for >= 2 grid steps when the batch
    # permits (megacore sharding on v7x), cap the tile for large batches.
    b_pad = _round_up(max(B, 8), 8)
    if b_pad >= 16:
        tb = min(max_batch_tile, _round_up((b_pad + 1) // 2, 8))
    else:
        tb = b_pad
    b_pad = _round_up(b_pad, tb)

    def pad_rows(a):
        p = b_pad - a.shape[0]
        return jnp.pad(a, ((0, p), (0, 0))) if p else a

    inputs = [pad_rows(reg)]
    if le > 0:
        inputs.append(pad_rows(exp))
    inputs.append(pad_rows(inv))
    weights = [w1, b1, w2, b2, w3, b3]

    grid = (b_pad // tb,)

    def batched(a):                     # blocked over the batch axis
        return pl.BlockSpec((tb, a.shape[1]), lambda i: (i, 0))

    def resident(a):                    # full array, same block every step
        return pl.BlockSpec(a.shape, lambda i: (0, 0))

    in_specs = [batched(a) for a in inputs] + [resident(w) for w in weights]

    h1p, h2p = w2.shape
    outw = w3.shape[1]
    flops = 2 * b_pad * ((lr + le) * h1p + h1p * h2p + h2p * outw)
    bytes_accessed = 4 * int(sum(int(a.size) for a in inputs) +
                             sum(int(w.size) for w in weights) +
                             b_pad * out_n)

    return pl.pallas_call(
        _make_fused_kernel(lr, le),
        out_shape=jax.ShapeDtypeStruct((b_pad, out_n), jnp.float32),
        grid=grid,
        in_specs=in_specs,
        out_specs=pl.BlockSpec((tb, out_n), lambda i: (i, 0)),
        compiler_params=pltpu.CompilerParams(
            dimension_semantics=("parallel",)),
        cost_estimate=pl.CostEstimate(flops=int(flops), transcendentals=0,
                                      bytes_accessed=bytes_accessed),
    )(*inputs, *weights)


def _torch_linear_init(key, fan_in, fan_out):
    """Deterministic stand-in for torch.nn.Linear default init: U(-k, k), k=1/sqrt(fan_in)."""
    k = 1.0 / math.sqrt(fan_in)
    kw, kb = jax.random.split(key)
    w = jax.random.uniform(kw, (fan_in, fan_out), jnp.float32, -k, k)
    b = jax.random.uniform(kb, (1, fan_out), jnp.float32, -k, k)
    return w, b


class DualFullyConnectedRegressionControllerCompressedPallas:
    """Pallas port of the PyTorch controller for n_hidden_units=[H1, H2] (3 Linear layers)."""

    def __init__(self, lr, le, n_hidden_units, key):
        assert len(n_hidden_units) == 2, "kernel is written for two hidden layers"
        self.lr = lr
        self.le = le
        h1, h2 = n_hidden_units
        h1p = _round_up(h1, _LANE)
        h2p = _round_up(h2, _LANE)

        k1, k2, k3 = jax.random.split(key, 3)
        w1, b1 = _torch_linear_init(k1, lr + le, h1)   # input layer
        w2, b2 = _torch_linear_init(k2, h1, h2)        # intermediate layer
        w3, b3 = _torch_linear_init(k3, h2, 2)         # output layer

        # Zero-pad all hidden feature dims to 128 so every activation tile is
        # lane-dense; padded lanes stay exactly 0 through bias/relu, and the
        # output is only stored on its first _OUT_NARROW lanes.
        self.w1 = jnp.pad(w1, ((0, 0), (0, h1p - h1)))
        self.b1 = jnp.pad(b1, ((0, 0), (0, h1p - h1)))
        self.w2 = jnp.pad(w2, ((0, h1p - h1), (0, h2p - h2)))
        self.b2 = jnp.pad(b2, ((0, 0), (0, h2p - h2)))
        self.w3 = jnp.pad(w3, ((0, h2p - h2), (0, _LANE - 2)))
        self.b3 = jnp.pad(b3, ((0, 0), (0, _LANE - 2)))

    def __call__(self, current_demand, current_inventory,
                 past_regular_orders, past_expedited_orders):
        # current_demand is unused by the reference forward pass as well.
        B = past_regular_orders.shape[0]
        reg = past_regular_orders.astype(jnp.float32)
        exp = past_expedited_orders.astype(jnp.float32) if self.le > 0 else None
        inv = current_inventory.reshape(B, 1).astype(jnp.float32)

        out = mlp_forward_pallas(reg, exp, inv, self.lr, self.le,
                                 self.w1, self.b1, self.w2, self.b2,
                                 self.w3, self.b3)
        out = out[:B]
        qr = out[:, 0:1]
        qe = out[:, 1:2]
        return qr, qe


if __name__ == "__main__":
    key = jax.random.PRNGKey(0)
    k_params, k_dem, k_inv, k_reg, k_exp = jax.random.split(key, 5)

    B = 8          # batch
    lr, le = 4, 4  # regular / expedited lead times
    hist = 6       # stored order history length (>= lr, le)

    controller = DualFullyConnectedRegressionControllerCompressedPallas(
        lr=lr, le=le, n_hidden_units=[32, 32], key=k_params)

    current_demand = jax.random.uniform(k_dem, (B, 1), jnp.float32, 0.0, 10.0)  # unused by forward
    current_inventory = jax.random.uniform(k_inv, (B, 1), jnp.float32, 0.0, 20.0)
    past_regular_orders = jax.random.uniform(k_reg, (B, hist), jnp.float32, 0.0, 10.0)
    past_expedited_orders = jax.random.uniform(k_exp, (B, hist), jnp.float32, 0.0, 10.0)

    qr, qe = controller(current_demand, current_inventory,
                        past_regular_orders, past_expedited_orders)
    jax.block_until_ready((qr, qe))
    assert qr.shape == (B, 1) and qe.shape == (B, 1)
    print("KERNEL_OK")
</pallas_src>

<mosaic_0001>
module attributes {stable_mosaic.version = 11 : i64} {
  func.func @kernel(%arg0: i32, %arg1: memref<8x6xf32, #tpu.memory_space<vmem>>, %arg2: memref<8x6xf32, #tpu.memory_space<vmem>>, %arg3: memref<8x1xf32, #tpu.memory_space<vmem>>, %arg4: memref<8x128xf32, #tpu.memory_space<vmem>>, %arg5: memref<1x128xf32, #tpu.memory_space<vmem>>, %arg6: memref<128x128xf32, #tpu.memory_space<vmem>>, %arg7: memref<1x128xf32, #tpu.memory_space<vmem>>, %arg8: memref<128x128xf32, #tpu.memory_space<vmem>>, %arg9: memref<1x128xf32, #tpu.memory_space<vmem>>, %arg10: memref<8x8xf32, #tpu.memory_space<vmem>>) attributes {dimension_semantics = [#tpu.dimension_semantics<parallel>], iteration_bounds = array<i64: 1>, scalar_prefetch = 0 : i64, scratch_operands = 0 : i64, tpu.core_type = #tpu.core_type<tc>, window_params = [{transform_indices = @transform_0, window_bounds = array<i64: 8, 6>}, {transform_indices = @transform_1, window_bounds = array<i64: 8, 6>}, {transform_indices = @transform_2, window_bounds = array<i64: 8, 1>}, {pipeline_mode = #tpu.pipeline_mode<synchronous>, transform_indices = @transform_3, window_bounds = array<i64: 8, 128>}, {pipeline_mode = #tpu.pipeline_mode<synchronous>, transform_indices = @transform_4, window_bounds = array<i64: 1, 128>}, {pipeline_mode = #tpu.pipeline_mode<synchronous>, transform_indices = @transform_5, window_bounds = array<i64: 128, 128>}, {pipeline_mode = #tpu.pipeline_mode<synchronous>, transform_indices = @transform_6, window_bounds = array<i64: 1, 128>}, {pipeline_mode = #tpu.pipeline_mode<synchronous>, transform_indices = @transform_7, window_bounds = array<i64: 128, 128>}, {pipeline_mode = #tpu.pipeline_mode<synchronous>, transform_indices = @transform_8, window_bounds = array<i64: 1, 128>}, {transform_indices = @transform_9, window_bounds = array<i64: 8, 8>}]} {
    %c0 = arith.constant 0 : index
    %c2 = arith.constant 2 : index
    %0 = vector.load %arg1[%c0, %c2] : memref<8x6xf32, #tpu.memory_space<vmem>>, vector<8x4xf32>
    %c0_0 = arith.constant 0 : index
    %c2_1 = arith.constant 2 : index
    %1 = vector.load %arg2[%c0_0, %c2_1] : memref<8x6xf32, #tpu.memory_space<vmem>>, vector<8x4xf32>
    %2 = tpu.concatenate %0, %1 in 1 : vector<8x4xf32>, vector<8x4xf32> -> vector<8x8xf32>
    %c0_2 = arith.constant 0 : index
    %c0_3 = arith.constant 0 : index
    %3 = vector.load %arg4[%c0_2, %c0_3] : memref<8x128xf32, #tpu.memory_space<vmem>>, vector<8x128xf32>
    %cst = arith.constant dense<0.000000e+00> : vector<8x128xf32>
    %4 = tpu.matmul %2, %3, %cst {dimension_numbers = #tpu.dot_dimension_numbers<[1], [0], [0], [1], [0, 0, 1, 1], [], []>} : vector<8x8xf32>, vector<8x128xf32>, vector<8x128xf32> -> vector<8x128xf32>
    %c0_4 = arith.constant 0 : index
    %c0_5 = arith.constant 0 : index
    %5 = vector.load %arg3[%c0_4, %c0_5] : memref<8x1xf32, #tpu.memory_space<vmem>>, vector<8x1xf32>
    %c0_6 = arith.constant 0 : index
    %c0_7 = arith.constant 0 : index
    %6 = vector.load %arg4[%c0_6, %c0_7] : memref<8x128xf32, #tpu.memory_space<vmem>>, vector<1x128xf32>
    %7 = vector.broadcast %5 : vector<8x1xf32> to vector<8x128xf32>
    %8 = vector.broadcast %6 : vector<1x128xf32> to vector<8x128xf32>
    %9 = arith.mulf %7, %8 : vector<8x128xf32>
    %10 = arith.addf %4, %9 : vector<8x128xf32>
    %c0_8 = arith.constant 0 : index
    %c0_9 = arith.constant 0 : index
    %11 = vector.load %arg5[%c0_8, %c0_9] : memref<1x128xf32, #tpu.memory_space<vmem>>, vector<1x128xf32>
    %12 = vector.broadcast %11 : vector<1x128xf32> to vector<8x128xf32>
    %13 = arith.addf %10, %12 : vector<8x128xf32>
    %cst_10 = arith.constant 0.000000e+00 : f32
    %14 = vector.broadcast %cst_10 : f32 to vector<8x128xf32>
    %15 = arith.maximumf %13, %14 : vector<8x128xf32>
    %c0_11 = arith.constant 0 : index
    %c0_12 = arith.constant 0 : index
    %16 = vector.load %arg6[%c0_11, %c0_12] : memref<128x128xf32, #tpu.memory_space<vmem>>, vector<128x128xf32>
    %cst_13 = arith.constant dense<0.000000e+00> : vector<8x128xf32>
    %17 = tpu.matmul %15, %16, %cst_13 {dimension_numbers = #tpu.dot_dimension_numbers<[1], [0], [0], [1], [0, 0, 1, 1], [], []>} : vector<8x128xf32>, vector<128x128xf32>, vector<8x128xf32> -> vector<8x128xf32>
    %c0_14 = arith.constant 0 : index
    %c0_15 = arith.constant 0 : index
    %18 = vector.load %arg7[%c0_14, %c0_15] : memref<1x128xf32, #tpu.memory_space<vmem>>, vector<1x128xf32>
    %19 = vector.broadcast %18 : vector<1x128xf32> to vector<8x128xf32>
    %20 = arith.addf %17, %19 : vector<8x128xf32>
    %cst_16 = arith.constant 0.000000e+00 : f32
    %21 = vector.broadcast %cst_16 : f32 to vector<8x128xf32>
    %22 = arith.maximumf %20, %21 : vector<8x128xf32>
    %c0_17 = arith.constant 0 : index
    %c0_18 = arith.constant 0 : index
    %23 = vector.load %arg8[%c0_17, %c0_18] : memref<128x128xf32, #tpu.memory_space<vmem>>, vector<128x128xf32>
    %cst_19 = arith.constant dense<0.000000e+00> : vector<8x128xf32>
    %24 = tpu.matmul %22, %23, %cst_19 {dimension_numbers = #tpu.dot_dimension_numbers<[1], [0], [0], [1], [0, 0, 1, 1], [], []>} : vector<8x128xf32>, vector<128x128xf32>, vector<8x128xf32> -> vector<8x128xf32>
    %c0_20 = arith.constant 0 : index
    %c0_21 = arith.constant 0 : index
    %25 = vector.load %arg9[%c0_20, %c0_21] : memref<1x128xf32, #tpu.memory_space<vmem>>, vector<1x128xf32>
    %26 = vector.broadcast %25 : vector<1x128xf32> to vector<8x128xf32>
    %27 = arith.addf %24, %26 : vector<8x128xf32>
    %28 = vector.extract_strided_slice %27 {offsets = [0, 0], sizes = [8, 8], strides = [1, 1]} : vector<8x128xf32> to vector<8x8xf32>
    %cst_22 = arith.constant 0.000000e+00 : f32
    %29 = vector.broadcast %cst_22 : f32 to vector<8x8xf32>
    %30 = arith.cmpf ole, %28, %29 : vector<8x8xf32>
    %cst_23 = arith.constant 0.000000e+00 : f32
    %31 = vector.broadcast %cst_23 : f32 to vector<8x8xf32>
    %32 = arith.select %30, %31, %28 : vector<8x8xi1>, vector<8x8xf32>
    %33 = math.floor %32 : vector<8x8xf32>
    %c0_24 = arith.constant 0 : index
    %c0_25 = arith.constant 0 : index
    %34 = vector.load %arg10[%c0_24, %c0_25] : memref<8x8xf32, #tpu.memory_space<vmem>>, vector<8x8xf32>
    tpu.vector_store %arg10[%c0_24, %c0_25], %33 {strides = array<i32>} : memref<8x8xf32, #tpu.memory_space<vmem>>, vector<8x8xf32>,
    return
  }
  func.func @transform_0(%arg0: i32) -> (i32, i32) {
    %c0_i32 = arith.constant 0 : i32
    %c0_i32_0 = arith.constant 0 : i32
    return %arg0, %c0_i32 : i32, i32
  }
  func.func @transform_1(%arg0: i32) -> (i32, i32) {
    %c0_i32 = arith.constant 0 : i32
    %c0_i32_0 = arith.constant 0 : i32
    return %arg0, %c0_i32 : i32, i32
  }
  func.func @transform_2(%arg0: i32) -> (i32, i32) {
    %c0_i32 = arith.constant 0 : i32
    %c0_i32_0 = arith.constant 0 : i32
    return %arg0, %c0_i32 : i32, i32
  }
  func.func @transform_3(%arg0: i32) -> (i32, i32) {
    %c0_i32 = arith.constant 0 : i32
    %c0_i32_0 = arith.constant 0 : i32
    %c0_i32_1 = arith.constant 0 : i32
    return %c0_i32, %c0_i32_0 : i32, i32
  }
  func.func @transform_4(%arg0: i32) -> (i32, i32) {
    %c0_i32 = arith.constant 0 : i32
    %c0_i32_0 = arith.constant 0 : i32
    %c0_i32_1 = arith.constant 0 : i32
    return %c0_i32, %c0_i32_0 : i32, i32
  }
  func.func @transform_5(%arg0: i32) -> (i32, i32) {
    %c0_i32 = arith.constant 0 : i32
    %c0_i32_0 = arith.constant 0 : i32
    %c0_i32_1 = arith.constant 0 : i32
    return %c0_i32, %c0_i32_0 : i32, i32
  }
  func.func @transform_6(%arg0: i32) -> (i32, i32) {
    %c0_i32 = arith.constant 0 : i32
    %c0_i32_0 = arith.constant 0 : i32
    %c0_i32_1 = arith.constant 0 : i32
    return %c0_i32, %c0_i32_0 : i32, i32
  }
  func.func @transform_7(%arg0: i32) -> (i32, i32) {
    %c0_i32 = arith.constant 0 : i32
    %c0_i32_0 = arith.constant 0 : i32
    %c0_i32_1 = arith.constant 0 : i32
    return %c0_i32, %c0_i32_0 : i32, i32
  }
  func.func @transform_8(%arg0: i32) -> (i32, i32) {
    %c0_i32 = arith.constant 0 : i32
    %c0_i32_0 = arith.constant 0 : i32
    %c0_i32_1 = arith.constant 0 : i32
    return %c0_i32, %c0_i32_0 : i32, i32
  }
  func.func @transform_9(%arg0: i32) -> (i32, i32) {
    %c0_i32 = arith.constant 0 : i32
    %c0_i32_0 = arith.constant 0 : i32
    return %arg0, %c0_i32 : i32, i32
  }
}

</mosaic_0001>

<bundles_post_ra>
// kernel: tpu_custom_call.1
= control target key start
LH: loop header
LB: loop body
LE: loop exit
PB: predicated region body
PF: predicated region fallthrough
CT: control target
= control target key end

     0   :  { %14 = vsyncpa [#allocation3], 0  ;;  %s817_s0 = inlined_call_operand.vmem [shape: f32[8,6], index: 0, kind: input, shape index: {}]   ;;  %s818_s1 = inlined_call_operand.hbm [shape: f32[8,6], index: 1, kind: input, shape index: {}]   ;;  %s819_s2 = inlined_call_operand.vmem [shape: f32[8,1], index: 2, kind: input, shape index: {}]   ;;  %s820_s3 = inlined_call_operand.vmem [shape: f32[8,128], index: 3, kind: input, shape index: {}]   ;;  %s821_s4 = inlined_call_operand.vmem [shape: f32[1,128], index: 4, kind: input, shape index: {}]   ;;  %s822_s5 = inlined_call_operand.hbm [shape: f32[128,128], index: 5, kind: input, shape index: {}]   ;;  %s823_s6 = inlined_call_operand.vmem [shape: f32[1,128], index: 6, kind: input, shape index: {}]   ;;  %s824_s7 = inlined_call_operand.hbm [shape: f32[128,128], index: 7, kind: input, shape index: {}]   ;;  %s825_s8 = inlined_call_operand.vmem [shape: f32[1,128], index: 8, kind: input, shape index: {}]   ;;  %s826_s9 = inlined_call_operand.hbm [shape: f32[8,8], index: 9, kind: output, shape index: {}]  }
   0x1   :  { %15 = vsyncpa [#allocation6], 0 }
   0x2   :  { %16 = vsyncpa [#allocation4], 0  ;;  %s659_s30 = smov [#allocation5]   ;;  %s565_s13 = scalar_lea.hbm %s822_s5, 2048 }
   0x3   :  { %s40_s10 = sshll.u32 %s659_s30, 4  ;;  %p566_p0 = scmp.ne.s32.totalorder %s822_s5, %s565_s13  ;;  %s41_s10 = int_to_ptr.vmem [resolvable:$true] %s40_s10 }
   0x4   :  { %p569_p1 = scmp.lt.u32.totalorder %s565_s13, %s822_s5 }
   0x6   :  { %p571_p2 = pnand %p569_p1, %p566_p0 }
   0x8   :  { %574 = shalt.err (!%p571_p2)
}
   0x9   :  { %s575_s18 = scalar_lea.vmem %s41_s10, 2048  ;;  %p580_p4 = scmp.lt.s32.totalorder %s41_s10, %s41_s10 }
   0xa   :  { %p576_p3 = scmp.ne.s32.totalorder %s41_s10, %s575_s18  ;;  %p581_p5 = scmp.lt.s32.totalorder %s575_s18, %s575_s18 }
   0xc   :  { %p582_p6 = por %p581_p5, %p580_p4 }
   0xe   :  { %p583_p7 = pnand %p582_p6, %p576_p3 }
  0x10   :  { %586 = shalt.err (!%p583_p7)
}
  0x11   :  { %s660_s19 = smov 128   ;;  %s661_s20 = smov 8  }
  0x12   :  { %46 = dma.hbm_to_vmem [thread:$0]  %s822_s5, 2048, %s41_s10, [#allocation6], %s660_s19, %s660_s19, %s661_s20  }
  0x13   :  { %s662_s23 = smov [#allocation2]   ;;  %s663_s25 = smov [#allocation7]  }
  0x14   :  { %s25_s24 = sshll.u32 %s662_s23, 4  ;;  %s54_s26 = sshll.u32 %s663_s25, 4  ;;  %s26_s24 = int_to_ptr.vmem [resolvable:$true] %s25_s24  ;;  %s55_s26 = int_to_ptr.vmem [resolvable:$true] %s54_s26 }
  0x15   :  { %s587_s29 = scalar_lea.hbm %s818_s1, 128 }
  0x16   :  { %p588_p8 = scmp.ne.s32.totalorder %s818_s1, %s587_s29  ;;  %p591_p9 = scmp.lt.u32.totalorder %s587_s29, %s818_s1 }
  0x18   :  { %p593_p10 = pnand %p591_p9, %p588_p8 }
  0x1a   :  { %596 = shalt.err (!%p593_p10)
}
  0x1b   :  { %s597_s5 = scalar_lea.vmem %s26_s24, 128  ;;  %p602_p12 = scmp.lt.s32.totalorder %s26_s24, %s26_s24 }
  0x1c   :  { %p598_p11 = scmp.ne.s32.totalorder %s26_s24, %s597_s5  ;;  %p603_p13 = scmp.lt.s32.totalorder %s597_s5, %s597_s5 }
  0x1e   :  { %p604_p0 = por %p603_p13, %p602_p12 }
  0x20   :  { %p605_p1 = pnand %p604_p0, %p598_p11 }
  0x22   :  { %608 = shalt.err (!%p605_p1)
}
  0x23   :  { %28 = dma.hbm_to_vmem [thread:$0]  %s818_s1, 128, %s26_s24, [#allocation3]  }
  0x24   :  { %s609_s17 = scalar_lea.hbm %s824_s7, 2048 }
  0x25   :  { %p610_p2 = scmp.ne.s32.totalorder %s824_s7, %s609_s17  ;;  %p613_p3 = scmp.lt.u32.totalorder %s609_s17, %s824_s7 }
  0x27   :  { %p615_p4 = pnand %p613_p3, %p610_p2 }
  0x29   :  { %618 = shalt.err (!%p615_p4)
}
  0x2a   :  { %s619_s25 = scalar_lea.vmem %s55_s26, 2048  ;;  %p624_p6 = scmp.lt.s32.totalorder %s55_s26, %s55_s26 }
  0x2b   :  { %p620_p5 = scmp.ne.s32.totalorder %s55_s26, %s619_s25  ;;  %p625_p7 = scmp.lt.s32.totalorder %s619_s25, %s619_s25 }
  0x2d   :  { %p626_p8 = por %p625_p7, %p624_p6 }
  0x2f   :  { %p627_p9 = pnand %p626_p8, %p620_p5 }
  0x31   :  { %630 = shalt.err (!%p627_p9)
}
  0x32   :  { %60 = dma.hbm_to_vmem [thread:$0]  %s824_s7, 2048, %s55_s26, [#allocation6], %s660_s19, %s660_s19, %s661_s20  }
  0x33   :  { %653 = dma.done.wait [#allocation3], 128  }
  0x34   :  { %654 = vsyncadd [#allocation3], 4294967168 }
  0x35   :  { %655 = dma.done.wait [#allocation6], 4096  }
  0x36   :  { %656 = vsyncadd [#allocation6], 4294963200  ;;  %v664_v0 = vmov 0.0   ;;  %vm665_vm0 = vmmov 0   ;;  %v666_v1 = vmov 0   ;;  %v667_v2 = vmov 0.0|0.0  }
  0x37   :  { %428 = vmatprep.subr.mxu0 %v664_v0  ;;  %430 = vmatprep.mubr.msk.f32.mxu0 %vm665_vm0, %v664_v0  ;;  %v72_v3 = vld [vmem:[%s817_s0] sm:$0xff]  ;;  %s668_s20 = smov 126   ;;  %v180_v6 = vld [vmem:[#allocation5] sm:$0xff]  ;;  %v181_v7 = vld [vmem:[#allocation5 + $0x8] sm:$0xff]  ;;  %s669_s0 = smov 2   ;;  %vm82_vm1 = vcmask 31744  }
  0x38   :  { %563 = vset.pattern.permute.xlu1 %v666_v1  ;;  %503 = vmatprep.subr.bf16.mxu1 %v667_v2  ;;  %v84_v4 = vld [vmem:[%s820_s3] sm:$0xff]  ;;  %v504_v9 = vpack.c.bf16 %v181_v7, %v180_v6  ;;  %v182_v10 = vld [vmem:[#allocation5 + $0x10] sm:$0xff]  ;;  %v184_v13 = vld [vmem:[#allocation5 + $0x20] sm:$0xff]  ;;  %vm97_vm2 = vcmask 64512   ;;  %s670_s10 = smov [#allocation8]  }
  0x39   :  { %465 = vmatprep.mubr.msk.f32.mxu1 %vm665_vm0, %v664_v0  ;;  %564 = vset.pattern.permute.xlu0 %v666_v1  ;;  %v85_v5 = vld [vmem:[%s819_s2] sm:$0xff]  ;;  %v185_v14 = vld [vmem:[#allocation5 + $0x28] sm:$0xff]  ;;  %v186_v16 = vld [vmem:[#allocation5 + $0x30] sm:$0xff]  ;;  %s377_s14 = sshll.u32 %s670_s10, 4  ;;  %s378_s14 = int_to_ptr.vmem [resolvable:$true] %s377_s14 }
  0x3a   :  { %75 = vrot.lane.b32.xlu0 %v72_v3, %s668_s20  ;;  %429 = vmatpush3.msra.mxu0 %v84_v4  ;;  %v73_v8 = vld [vmem:[#allocation2] sm:$0xff]  ;;  %v510_v15 = vpack.c.bf16 %v185_v14, %v184_v13  ;;  %v188_v19 = vld [vmem:[#allocation5 + $0x40] sm:$0xff]  ;;  %v189_v20 = vld [vmem:[#allocation5 + $0x48] sm:$0xff]  ;;  %p636_p11 = scmp.lt.s32.totalorder %s378_s14, %s378_s14 }
  0x3b   :  { %89 = vperm.xlu1 %563, %v85_v5   ;;  %v183_v11 = vld [vmem:[#allocation5 + $0x18] sm:$0xff]  ;;  %527 = vmatprep.subr.bf16.mxu0 %v667_v2  ;;  %v516_v21 = vpack.c.bf16 %v189_v20, %v188_v19  ;;  %v190_v22 = vld [vmem:[#allocation5 + $0x50] sm:$0xff]  ;;  %v192_v28 = vld [vmem:[#allocation5 + $0x60] sm:$0xff] }
  0x3c   :  { %505 = vmatpush3.bf16.msra.mxu1 %v504_v9  ;;  %v507_v12 = vpack.c.bf16 %v183_v11, %v182_v10  ;;  %v187_v17 = vld [vmem:[#allocation5 + $0x38] sm:$0xff]  ;;  %v193_v29 = vld [vmem:[#allocation5 + $0x68] sm:$0xff]  ;;  %v194_v31 = vld [vmem:[#allocation5 + $0x70] sm:$0xff] }
  0x3d   :  { %506 = vmatprep.subr.bf16.mxu1 %v667_v2  ;;  %v513_v18 = vpack.c.bf16 %v187_v17, %v186_v16  ;;  %v191_v23 = vld [vmem:[#allocation5 + $0x58] sm:$0xff]  ;;  %v522_v30 = vpack.c.bf16 %v193_v29, %v192_v28  ;;  %v274_v34 = vld [vmem:[#allocation7] sm:$0xff]  ;;  %v275_v35 = vld [vmem:[#allocation7 + $0x8] sm:$0xff] }
  0x3e   :  { %79 = vrot.lane.b32.xlu0 %v73_v8, %s669_s0  ;;  %v519_v24 = vpack.c.bf16 %v191_v23, %v190_v22  ;;  %v195_v32 = vld [vmem:[#allocation5 + $0x78] sm:$0xff]  ;;  %v276_v36 = vld [vmem:[#allocation7 + $0x10] sm:$0xff]  ;;  %v528_v37 = vpack.c.bf16 %v275_v35, %v274_v34  ;;  %v278_v40 = vld [vmem:[#allocation7 + $0x20] sm:$0xff] }
  0x3f   :  { %v525_v33 = vpack.c.bf16 %v195_v32, %v194_v31  ;;  %v277_v38 = vld [vmem:[#allocation7 + $0x18] sm:$0xff]  ;;  %v279_v41 = vld [vmem:[#allocation7 + $0x28] sm:$0xff]  ;;  %v280_v43 = vld [vmem:[#allocation7 + $0x30] sm:$0xff] }
  0x40   :  { %508 = vmatpush3.bf16.msra.mxu1 %v507_v12  ;;  %v531_v39 = vpack.c.bf16 %v277_v38, %v276_v36  ;;  %v534_v42 = vpack.c.bf16 %v279_v41, %v278_v40  ;;  %v281_v44 = vld [vmem:[#allocation7 + $0x38] sm:$0xff]  ;;  %v282_v46 = vld [vmem:[#allocation7 + $0x40] sm:$0xff]  ;;  %v283_v47 = vld [vmem:[#allocation7 + $0x48] sm:$0xff] }
  0x41   :  { %509 = vmatprep.subr.bf16.mxu1 %v667_v2  ;;  %v537_v45 = vpack.c.bf16 %v281_v44, %v280_v43  ;;  %v540_v48 = vpack.c.bf16 %v283_v47, %v282_v46  ;;  %v284_v49 = vld [vmem:[#allocation7 + $0x50] sm:$0xff]  ;;  %v285_v50 = vld [vmem:[#allocation7 + $0x58] sm:$0xff]  ;;  %v286_v52 = vld [vmem:[#allocation7 + $0x60] sm:$0xff] }
  0x42   :  { %v543_v51 = vpack.c.bf16 %v285_v50, %v284_v49  ;;  %v287_v53 = vld [vmem:[#allocation7 + $0x68] sm:$0xff]  ;;  %v387_v55 = vld [vmem:[%s820_s3] ss:$0 sm:$0xff] }
  0x43   :  { %v546_v54 = vpack.c.bf16 %v287_v53, %v286_v52  ;;  %v389_v59 = vld [vmem:[%s821_s4] ss:$0 sm:$0xff] }
  0x44   :  { %511 = vmatpush3.bf16.msra.mxu1 %v510_v15  ;;  %v289_v1 = vld [vmem:[#allocation7 + $0x78] sm:$0xff] }
  0x45   :  { %512 = vmatprep.subr.bf16.mxu1 %v667_v2  ;;  %v391_v8 = vld [vmem:[%s825_s8] ss:$0 sm:$0xff] }
  0x48   :  { %514 = vmatpush3.bf16.msra.mxu1 %v513_v18 }
  0x49   :  { %515 = vmatprep.subr.bf16.mxu1 %v667_v2 }
  0x4c   :  { %517 = vmatpush3.bf16.msra.mxu1 %v516_v21 }
  0x4d   :  { %518 = vmatprep.subr.bf16.mxu1 %v667_v2 }
  0x50   :  { %520 = vmatpush3.bf16.msra.mxu1 %v519_v24 }
  0x51   :  { %521 = vmatprep.subr.bf16.mxu1 %v667_v2 }
  0x54   :  { %523 = vmatpush3.bf16.msra.mxu1 %v522_v30 }
  0x55   :  { %524 = vmatprep.subr.bf16.mxu1 %v667_v2 }
  0x58   :  { %526 = vmatpush3.bf16.msra.mxu1 %v525_v33 }
  0xac   :  { %v76_v25 = vpop.permute.xlu0 %75 }
  0xb0   :  { %v80_v26 = vpop.permute.xlu0 %79 }
  0xb1   :  { %v83_v27 = vsel %vm82_vm1, %v76_v25, %v80_v26 }
  0xb2   :  { %431 = vmatmul.mubr.msk.f32.vlgmr.msra.gmra.mrb[0].mxu0 %vm97_vm2, %v83_v27 }
  0xb3   :  { %500 = vmatprep.mubr.msk.f32.mxu0 %vm665_vm0, %v664_v0  ;;  %529 = vmatpush3.bf16.msra.mxu0 %v528_v37  ;;  %v288_v0 = vld [vmem:[#allocation7 + $0x70] sm:$0xff] }
  0xb4   :  { %530 = vmatprep.subr.bf16.mxu0 %v667_v2  ;;  %v549_v3 = vpack.c.bf16 %v289_v1, %v288_v0 }
  0xb7   :  { %532 = vmatpush3.bf16.msra.mxu0 %v531_v39 }
  0xb8   :  { %533 = vmatprep.subr.bf16.mxu0 %v667_v2 }
  0xba   :  { %v90_v56 = vpop.permute.xlu1 %89 }
  0xbb   :  { %535 = vmatpush3.bf16.msra.mxu0 %v534_v42  ;;  %v96_v57 = vmul.f32 %v387_v55, %v90_v56 }
  0xbc   :  { %536 = vmatprep.subr.bf16.mxu0 %v667_v2 }
  0xbf   :  { %538 = vmatpush3.bf16.msra.mxu0 %v537_v45 }
  0xc0   :  { %539 = vmatprep.subr.bf16.mxu0 %v667_v2 }
  0xc3   :  { %541 = vmatpush3.bf16.msra.mxu0 %v540_v48 }
  0xc4   :  { %542 = vmatprep.subr.bf16.mxu0 %v667_v2 }
  0xc7   :  { %544 = vmatpush3.bf16.msra.mxu0 %v543_v51 }
  0xc8   :  { %545 = vmatprep.subr.bf16.mxu0 %v667_v2 }
  0xcb   :  { %547 = vmatpush3.bf16.msra.mxu0 %v546_v54 }
  0xcc   :  { %548 = vmatprep.subr.bf16.mxu0 %v667_v2  ;;  %v390_v2 = vld [vmem:[%s823_s6] ss:$0 sm:$0xff]  ;;  %s631_s6 = scalar_lea.vmem %s378_s14, 128 }
  0xcd   :  { %p632_p10 = scmp.ne.s32.totalorder %s378_s14, %s631_s6  ;;  %p637_p12 = scmp.lt.s32.totalorder %s631_s6, %s631_s6 }
  0xcf   :  { %550 = vmatpush3.bf16.msra.mxu0 %v549_v3  ;;  %p638_p13 = por %p637_p12, %p636_p11 }
  0xd1   :  { %p639_p0 = pnand %p638_p13, %p632_p10 }
 0x185   :  { %v167_v58 = vpop.f32.mrb[0].mxu0 }
 0x186   :  { %v168_v60 = vadd.f32 %v167_v58, %v96_v57  ;;  %v432_v61 = vpop.f32.mrb[1].mxu0 }
 0x188   :  { %v178_v62 = vadd.f32 %v389_v59, %v168_v60 }
 0x18a   :  { %v179_v63 = vmax.f32 %v178_v62, 0.0 }
 0x18c   :  { %466 = vmatmul.mubr.f32.vlgmr.msra.gmra.mrb[0].mxu1 %v179_v63 }
 0x25f   :  { %v269_v4 = vpop.f32.mrb[0].mxu1 }
 0x260   :  { %v270_v5 = vadd.f32 %v390_v2, %v269_v4  ;;  %v467_v6 = vpop.f32.mrb[1].mxu1 }
 0x262   :  { %v273_v7 = vmax.f32 %v270_v5, 0.0 }
 0x264   :  { %501 = vmatmul.mubr.f32.vlgmr.msra.gmra.mrb[2].mxu0 %v273_v7 }
 0x337   :  { %v363_v9 = vpop.f32.mrb[2].mxu0 }
 0x338   :  { %v364_v10 = vadd.f32 %v391_v8, %v363_v9  ;;  %v502_v11 = vpop.f32.mrb[3].mxu0 }
 0x33a   :  { %vm367_vm3 = vcmp.le.f32.partialorder %v364_v10, 0.0 }
 0x33b   :  { %v368_v12 = vsel %vm367_vm3, 0.0, %v364_v10 }
 0x33c   :  { %v369_v13 = vfloor.f32 %v368_v12 }
 0x33e   :  { %370 = vst.msk [vmem:[#allocation8] sm:$0xff] %vm97_vm2, %v369_v13 }
 0x33f   :  { %642 = shalt.err (!%p639_p0)
}
 0x340   :  { %s643_s16 = scalar_lea.hbm %s826_s9, 128 }
 0x341   :  { %p644_p1 = scmp.ne.s32.totalorder %s826_s9, %s643_s16  ;;  %p647_p2 = scmp.lt.u32.totalorder %s643_s16, %s826_s9 }
 0x343   :  { %p649_p3 = pnand %p647_p2, %p644_p1 }
 0x345   :  { %652 = shalt.err (!%p649_p3)
}
 0x346   :  { %380 = dma.vmem_to_hbm [thread:$0]  %s378_s14, 128, %s826_s9, [#allocation4]  }
 0x347   :  { %657 = dma.done.wait [#allocation4], 128  }
 0x348   :  { %658 = vsyncadd [#allocation4], 4294967168 }
 0x349   :  { %384 = vsyncpa [#allocation3], 1 }
 0x34a   :  { %385 = vsyncpa [#allocation6], 1 }
 0x34b   :  { %386 = vsyncpa [#allocation4], 1 }

</bundles_post_ra>
